<compile_context>
chip_gen: v5e
topology: v5e:2x2
jax: 0.10.0
libtpu: 0.0.40
codegen_flags: <defaults>
</compile_context>

<pallas_src>
import jax
import jax.numpy as jnp
from jax.experimental import pallas as pl
from jax.experimental.pallas import tpu as pltpu

_EPSILON = 1e-10
_LANE = 128      # TPU vreg lane width
_SUBLANE = 8     # TPU vreg sublane count (f32)


def _make_ndi_kernel(num_channels: int, index_a: int, index_b: int):
    """Kernel: DMA-copy the C pass-through channels, compute+store the NDI channel."""

    def ndi_kernel(x_ref, o_ref, copy_sem):
        # x_ref: (1, C, tile_rows, 128) VMEM block
        # o_ref: (1, C+1, tile_rows, 128) VMEM block
        # Bulk pass-through copy as a local DMA so it never occupies vregs or
        # vector load/store bundle slots.
        cp = pltpu.make_async_copy(x_ref, o_ref.at[:, :num_channels, :, :], copy_sem)
        cp.start()

        # NDI compute on just the two bands: dense (tile_rows, 128) vregs,
        # exact f32 divide, cast back to output dtype.
        band_a = x_ref[:, index_a, :, :].astype(jnp.float32)
        band_b = x_ref[:, index_b, :, :].astype(jnp.float32)
        ndi = (band_a - band_b) / (band_a + band_b + _EPSILON)
        o_ref[:, num_channels, :, :] = ndi.astype(o_ref.dtype)

        cp.wait()

    return ndi_kernel


def _vmem_budget_bytes() -> int:
    """Target bytes for the double-buffered in+out blocks (per-generation)."""
    try:
        cap = pltpu.get_tpu_info().vmem_capacity_bytes
    except Exception:
        cap = 64 * 1024 * 1024  # assume the smallest generation (v7x per-TC)
    # ~1/4 of physical VMEM for the pipeline blocks, capped at 32 MiB.
    return max(8 << 20, min(cap // 4, 32 << 20))


def append_normalized_difference_index(image: jax.Array,
                                       index_a: int,
                                       index_b: int) -> jax.Array:
    """Append NDI channel along dim=-3 of an (..., C, H, W) tensor."""
    assert jnp.issubdtype(image.dtype, jnp.floating), (
        "NDI in [-1, 1] requires a floating-point image dtype")
    *lead, C, H, W = image.shape
    B = 1
    for d in lead:
        B *= d
    B = max(B, 1)
    hw = H * W

    # --- layout: (B, C, rows, 128), lane- and sublane-dense -----------------
    aligned = (hw % _LANE == 0)
    if aligned:
        rows = hw // _LANE
        x = image.reshape(B, C, rows, _LANE)
    else:
        # Ragged fallback: one extra HBM pass for pad + final slice.
        rows = pl.cdiv(hw, _LANE)
        hw_pad = rows * _LANE
        # Zero padding is NaN-safe: (0-0)/(0+0+eps) = 0; sliced off below.
        x = jnp.pad(image.reshape(B, C, hw), ((0, 0), (0, 0), (0, hw_pad - hw)))
        x = x.reshape(B, C, rows, _LANE)

    # --- tile sizing from the VMEM budget ------------------------------------
    itemsize = jnp.dtype(image.dtype).itemsize
    budget = _vmem_budget_bytes()
    # Double-buffered footprint ~= 2 * (C + C+1) * tile_rows * 128 * itemsize.
    denom = 2 * (2 * C + 1) * _LANE * itemsize
    tile_rows_max = max(_SUBLANE, (budget // denom) // _SUBLANE * _SUBLANE)

    if rows <= tile_rows_max:
        tile_rows, num_tiles = rows, 1
    else:
        num_tiles = pl.cdiv(rows, tile_rows_max)
        tile_rows = pl.cdiv(pl.cdiv(rows, num_tiles), _SUBLANE) * _SUBLANE
        num_tiles = pl.cdiv(rows, tile_rows)

    # v7x has 2 TensorCores: ensure the parallel grid has >= 2 steps if possible.
    if B * num_tiles < 2 and rows >= 2 * _SUBLANE:
        tile_rows = pl.cdiv(pl.cdiv(rows, 2), _SUBLANE) * _SUBLANE
        num_tiles = pl.cdiv(rows, tile_rows)

    kernel = _make_ndi_kernel(C, index_a, index_b)

    # Advisory cost: clearly memory-bound, ~5 flops per output NDI pixel.
    bytes_accessed = (2 * C + 1) * B * rows * _LANE * itemsize
    flops = 5 * B * rows * _LANE

    out = pl.pallas_call(
        kernel,
        out_shape=jax.ShapeDtypeStruct((B, C + 1, rows, _LANE), image.dtype),
        grid=(B, num_tiles),
        in_specs=[
            pl.BlockSpec((1, C, tile_rows, _LANE), lambda b, p: (b, 0, p, 0)),
        ],
        out_specs=pl.BlockSpec((1, C + 1, tile_rows, _LANE), lambda b, p: (b, 0, p, 0)),
        scratch_shapes=[pltpu.SemaphoreType.DMA(())],
        compiler_params=pltpu.CompilerParams(
            dimension_semantics=("parallel", "parallel"),
            vmem_limit_bytes=min(2 * budget, 48 << 20)),
        cost_estimate=pl.CostEstimate(
            flops=flops, transcendentals=0, bytes_accessed=bytes_accessed),
    )(x)

    if aligned:
        return out.reshape(*lead, C + 1, H, W)
    out = out.reshape(B, C + 1, rows * _LANE)[:, :, :hw]
    return out.reshape(*lead, C + 1, H, W)


def reference_append_ndi(image: jnp.ndarray, index_a: int, index_b: int) -> jnp.ndarray:
    """Pure-JAX reference matching the PyTorch semantics exactly."""
    band_a = image[..., index_a, :, :]
    band_b = image[..., index_b, :, :]
    ndi = (band_a - band_b) / (band_a + band_b + _EPSILON)
    ndi = jnp.expand_dims(ndi, axis=-3)
    return jnp.concatenate([image, ndi], axis=-3)


if __name__ == "__main__":
    key = jax.random.PRNGKey(0)
    B, C, H, W = 2, 4, 16, 16
    index_a, index_b = 0, 3  # e.g. NDVI-like index from channels 0 and 3

    image = jax.random.uniform(key, (B, C, H, W), dtype=jnp.float32)

    out = append_normalized_difference_index(image, index_a, index_b)
    out = jax.block_until_ready(out)

    ref = reference_append_ndi(image, index_a, index_b)

    assert out.shape == (B, C + 1, H, W), out.shape
    assert jnp.allclose(out, ref, atol=1e-6, rtol=1e-6), "mismatch vs reference"

    print("KERNEL_OK")
</pallas_src>

<mosaic_0001>
module attributes {stable_mosaic.version = 11 : i64} {
  func.func @ndi_kernel(%arg0: i32, %arg1: i32, %arg2: memref<1x4x2x128xf32, #tpu.memory_space<vmem>>, %arg3: memref<1x5x2x128xf32, #tpu.memory_space<vmem>>, %arg4: memref<!tpu.dma_semaphore, #tpu.memory_space<semaphore_mem>>) attributes {dimension_semantics = [#tpu.dimension_semantics<parallel>, #tpu.dimension_semantics<parallel>], iteration_bounds = array<i64: 2, 1>, scalar_prefetch = 0 : i64, scratch_operands = 1 : i64, tpu.core_type = #tpu.core_type<tc>, window_params = [{transform_indices = @transform_0, window_bounds = array<i64: 1, 4, 2, 128>}, {transform_indices = @transform_1, window_bounds = array<i64: 1, 5, 2, 128>}]} {
    %c0_i32 = arith.constant 0 : i32
    %c0_i32_0 = arith.constant 0 : i32
    %c0_i32_1 = arith.constant 0 : i32
    %c0_i32_2 = arith.constant 0 : i32
    %0 = tpu.memref_slice %arg3[%c0_i32, %c0_i32_0, %c0_i32_1, %c0_i32_2] : memref<1x5x2x128xf32, #tpu.memory_space<vmem>> -> memref<1x4x2x128xf32, #tpu.memory_space<vmem>>
    tpu.enqueue_dma source(%arg2 : memref<1x4x2x128xf32, #tpu.memory_space<vmem>>) target(%0 : memref<1x4x2x128xf32, #tpu.memory_space<vmem>>) target_semaphore(%arg4 : memref<!tpu.dma_semaphore, #tpu.memory_space<semaphore_mem>>)
    %c0 = arith.constant 0 : index
    %c0_3 = arith.constant 0 : index
    %c0_4 = arith.constant 0 : index
    %c0_5 = arith.constant 0 : index
    %1 = vector.load %arg2[%c0, %c0_3, %c0_4, %c0_5] : memref<1x4x2x128xf32, #tpu.memory_space<vmem>>, vector<1x1x2x128xf32>
    %2 = vector.shape_cast %1 : vector<1x1x2x128xf32> to vector<1x2x128xf32>
    %c0_6 = arith.constant 0 : index
    %c3 = arith.constant 3 : index
    %c0_7 = arith.constant 0 : index
    %c0_8 = arith.constant 0 : index
    %3 = vector.load %arg2[%c0_6, %c3, %c0_7, %c0_8] : memref<1x4x2x128xf32, #tpu.memory_space<vmem>>, vector<1x1x2x128xf32>
    %4 = vector.shape_cast %3 : vector<1x1x2x128xf32> to vector<1x2x128xf32>
    %5 = arith.subf %2, %4 : vector<1x2x128xf32>
    %6 = arith.addf %2, %4 : vector<1x2x128xf32>
    %cst = arith.constant 1.000000e-10 : f32
    %7 = vector.broadcast %cst : f32 to vector<1x2x128xf32>
    %8 = arith.addf %6, %7 : vector<1x2x128xf32>
    %9 = arith.divf %5, %8 : vector<1x2x128xf32>
    %c0_9 = arith.constant 0 : index
    %c4 = arith.constant 4 : index
    %c0_10 = arith.constant 0 : index
    %c0_11 = arith.constant 0 : index
    %10 = vector.load %arg3[%c0_9, %c4, %c0_10, %c0_11] : memref<1x5x2x128xf32, #tpu.memory_space<vmem>>, vector<1x1x2x128xf32>
    %11 = vector.shape_cast %10 : vector<1x1x2x128xf32> to vector<1x2x128xf32>
    %12 = vector.shape_cast %9 : vector<1x2x128xf32> to vector<1x1x2x128xf32>
    tpu.vector_store %arg3[%c0_9, %c4, %c0_10, %c0_11], %12 {strides = array<i32>} : memref<1x5x2x128xf32, #tpu.memory_space<vmem>>, vector<1x1x2x128xf32>,
    %c0_i32_12 = arith.constant 0 : i32
    %c0_i32_13 = arith.constant 0 : i32
    %c0_i32_14 = arith.constant 0 : i32
    %c0_i32_15 = arith.constant 0 : i32
    %13 = tpu.memref_slice %arg3[%c0_i32_12, %c0_i32_13, %c0_i32_14, %c0_i32_15] : memref<1x5x2x128xf32, #tpu.memory_space<vmem>> -> memref<1x4x2x128xf32, #tpu.memory_space<vmem>>
    tpu.wait_dma2 semaphore(%arg4 : memref<!tpu.dma_semaphore, #tpu.memory_space<semaphore_mem>>) src(%arg2 : memref<1x4x2x128xf32, #tpu.memory_space<vmem>>) dst(%13 : memref<1x4x2x128xf32, #tpu.memory_space<vmem>>)
    return
  }
  func.func @transform_0(%arg0: i32, %arg1: i32) -> (i32, i32, i32, i32) {
    %c0_i32 = arith.constant 0 : i32
    %c0_i32_0 = arith.constant 0 : i32
    %c0_i32_1 = arith.constant 0 : i32
    return %arg0, %c0_i32, %arg1, %c0_i32_0 : i32, i32, i32, i32
  }
  func.func @transform_1(%arg0: i32, %arg1: i32) -> (i32, i32, i32, i32) {
    %c0_i32 = arith.constant 0 : i32
    %c0_i32_0 = arith.constant 0 : i32
    %c0_i32_1 = arith.constant 0 : i32
    return %arg0, %c0_i32, %arg1, %c0_i32_0 : i32, i32, i32, i32
  }
}

</mosaic_0001>

<bundles_post_ra>
// kernel: tpu_custom_call.1
= control target key start
LH: loop header
LB: loop body
LE: loop exit
PB: predicated region body
PF: predicated region fallthrough
CT: control target
= control target key end

     0   :  { %6 = vsyncpa [#allocation4], 0  ;;  %s670_s0 = inlined_call_operand.hbm [shape: f32[2,4,2,128], index: 0, kind: input, shape index: {}]   ;;  %s671_s1 = inlined_call_operand.hbm [shape: f32[2,5,2,128], index: 1, kind: output, shape index: {}]  }
   0x1   :  { %8 = vsyncpa [#allocation4 + $0x1], 0 }
   0x2   :  { %9 = vsyncpa [#allocation5], 0 }
   0x3   :  { %11 = vsyncpa [#allocation5 + $0x1], 0  ;;  %s544_s6 = smov 0   ;;  %s546_s7 = smov 0  }
   0x4   :  { %s548_s8 = smov 0   ;;  %s550_s9 = smov 0  }
   0x5   :  { %s552_s10 = smov 0   ;;  %s554_s11 = smov 0  }
   0x6 LB: > { %s328_s12 = sadd.s32 4294967295, %s528_s11   ;;  %s329_s13 = sadd.s32 4294967294, %s528_s11   ;;  %s528_s11 = sphi %s554_s11, %s17_s11   ;;  %s524_s10 = sphi %s552_s10, %s680_s10   ;;  %s520_s9 = sphi %s550_s9, %s679_s9   ;;  %s516_s8 = sphi %s548_s8, %s678_s8   ;;  %s512_s7 = sphi %s546_s7, %s677_s7   ;;  %s508_s6 = sphi %s544_s6, %s676_s6  }
   0x7   : > { %s29_s14 = sadd.s32 1, %s524_s10  ;;  %s38_s15 = sadd.s32 1, %s516_s8 }
   0x8   : > { %p31_p0 = scmp.ge.s32.totalorder %s29_s14, 2  ;;  %p45_p1 = scmp.ne.s32.totalorder %s516_s8, %s512_s7 }
   0x9   : > { %p46_p2 = scmp.eq.s32.totalorder %s528_s11, 0  ;;  %p51_p3 = scmp.ne.s32.totalorder %s512_s7, %s508_s6 }
   0xa   : > { %s682_s14 = smov (%p31_p0, %s29_s14), 0  ;;  %p52_p5 = scmp.eq.s32.totalorder %s328_s12, 0 }
   0xb   : > { %p585_p4 = por %p46_p2, %p45_p1  ;;  %s33_s17 = ssub.s32 %s524_s10, %s682_s14 }
   0xc   : > { %p77_p6 = scmp.eq.s32.totalorder %s328_s12, 1  ;;  %p36_p7 = scmp.eq.s32.totalorder %s33_s17, 0 }
   0xd   : > { %p591_p8 = por %p52_p5, %p51_p3  ;;  %p83_p10 = scmp.eq.s32.totalorder %s329_s13, 1 }
   0xe   : > { %p595_p9 = por %p77_p6, %p45_p1  ;;  %p331_p12 = scmp.ge.s32.totalorder %s528_s11, 2 }
   0xf   : > { %s600_s20 = scalar_select %p36_p7, %s516_s8, %s38_s15  }
  0x10   : > { %p602_p11 = por %p83_p10, %p51_p3  ;;  %p358_p13 = scmp.lt.s32.totalorder %s528_s11, 2 }
  0x11   : > { %s103_s22 = sand.u32 1, %s516_s8   ;;  %s343_s24 = sshll.u32 %s524_s10, 3 }
  0x12   : > { %s332_s23 = sshll.u32 %s103_s22, 3  ;;  %s113_s27 = scalar_lea.hbm %s670_s0, %s343_s24 }
  0x13   : > { %s107_s28 = scalar_lea.vmem [#allocation3], %s332_s23  ;;  %s114_s30 = sshll.u32 %s113_s27, 4  ;;  %s115_s30 = int_to_ptr.hbm [resolvable:$true] %s114_s30 }
  0x14   : > { %s116_s29 = sshll.u32 %s107_s28, 4  ;;  %p351_p0 = pnand %p358_p13, %p585_p4  ;;  %s117_s29 = int_to_ptr.vmem [resolvable:$true] %s116_s29 }
  0x15   : > { %p335_p1 = scmp.ge.s32.totalorder %s528_s11, 1  ;;  %s104_s2 = scalar_lea.sflag [#allocation4], %s103_s22 }
  0x16   : > { %s530_s3 = smov 32   ;;  %s531_s4 = smov 2  }
  0x17   : > { %353 = dma.hbm_to_vmem [thread:$0]  (!%p351_p0), %s115_s30, 128, %s117_s29, %s104_s2, %s530_s3, %s530_s3, %s531_s4  }
  0x18   : > { %p124_p2 = scmp.lt.s32.totalorder %s528_s11, 3 }
  0x1a   : > { %p125_p3 = pnand %p335_p1, %p124_p2 }
  0x1b   : > { %s618_s5 = sand.u32 (!%p125_p3), 1, %s512_s7  }
  0x1c   : > { %128 = sbr.rel (%p125_p3) target bundleno = 81 (0x51), region = 24  ;;  %s336_s12 = sshll.u32 (!%p125_p3), %s618_s5, 3 }
  0x1d   : > { %s131_s13 = scalar_lea.sflag (!%p125_p3), [#allocation4], %s618_s5  ;;  %s134_s15 = scalar_lea.vmem (!%p125_p3), [#allocation3], %s336_s12 }
  0x21   : > { %497 = dma.done.wait (%p591_p8), %s131_s13, 128  }
  0x22   : > { %499 = vsyncadd (%p591_p8), %s131_s13, 4294967168  ;;  %s344_s16 = smul.u32 10, %s618_s5  ;;  %v180_v0 = vld [vmem:[%s134_s15] sm:$0xff] }
  0x24   : > { %s627_s17 = scalar_lea.vmem [#allocation6], %s344_s16 }
  0x25   : > { %181 = vst [vmem:[%s627_s17] sm:$0xff] %v180_v0 }
  0x26   : > { %187 = vsyncadd [#allocation2], 128  ;;  %v188_v1 = vld [vmem:[%s134_s15] sm:$0x3]  ;;  %v337_v2 = vld [vmem:[%s134_s15 + $0x6] sm:$0x3] }
  0x27   : > { %v192_v3 = vadd.f32 %v337_v2, %v188_v1  ;;  %v191_v12 = vsub.f32 %v188_v1, %v337_v2 }
  0x29   : > { %v193_v4 = vadd.f32 1e-10, %v192_v3 }
  0x2b   : > { %412 = vrcp.f32 %v193_v4  ;;  %v205_v7 = vand.u32 2147483648, %v193_v4  ;;  %vm199_vm0 = vweird.f32 %v193_v4  ;;  %v203_v9 = vand.u32 2147483647, %v193_v4 }
  0x2d   : > { %v206_v11 = vor.u32 1.1754944e-38, %v205_v7  ;;  %vm204_vm3 = vcmp.eq.f32.partialorder %v203_v9, 8.507059e+37 }
  0x31   : > { %v413_v5 = vpop.eup %412 }
  0x32   : > { %v195_v6 = vmul.f32 %v413_v5, %v193_v4  ;;  %vm200_vm1 = vweird.f32 %v413_v5 }
  0x33   : > { %vm201_vm2 = vmor %vm199_vm0, %vm200_vm1 }
  0x34   : > { %v196_v8 = vsub.f32 1.0, %v195_v6 }
  0x36   : > { %v197_v10 = vmul.f32 %v413_v5, %v196_v8 }
  0x38   : > { %v198_v13 = vadd.f32 %v413_v5, %v197_v10 }
  0x3a   : > { %v202_v14 = vsel %vm201_vm2, %v413_v5, %v198_v13 }
  0x3b   : > { %v207_v15 = vsel %vm204_vm3, %v206_v11, %v202_v14 }
  0x3c   : > { %v208_v16 = vmul.f32 %v207_v15, %v191_v12 }
  0x3e   : > { %338 = vst [vmem:[%s627_s17 + $0x8] sm:$0x3] %v208_v16 }
  0x3f   : > { %500 = dma.done.wait [#allocation2], 128 }
  0x40   : > { %501 = vsyncadd [#allocation2], 4294967168  ;;  %s345_s18 = smul.u32 10, %s520_s9  ;;  %s230_s22 = sshll.u32 %s627_s17, 4  ;;  %s231_s22 = int_to_ptr.vmem [resolvable:$true] %s230_s22 }
  0x41   : > { %s217_s27 = scalar_lea.sflag [#allocation5], %s618_s5  ;;  %s464_s9 = scalar_lea.hbm %s671_s1, 20 }
  0x42   : > { %s229_s25 = scalar_lea.hbm %s671_s1, %s345_s18 }
  0x43   : > { %s232_s26 = sshll.u32 %s229_s25, 4  ;;  %s233_s26 = int_to_ptr.hbm [resolvable:$true] %s232_s26 }
  0x44   : > { %s458_s28 = sshra.s32 %s233_s26, 4  ;;  %s459_s28 = int_to_ptr.hbm [resolvable:$true] %s458_s28 }
  0x45   : > { %s460_s29 = scalar_lea.hbm %s459_s28, 10  ;;  %p465_p7 = scmp.lt.s32.totalorder %s459_s28, %s671_s1 }
  0x46   : > { %p461_p4 = scmp.ne.s32.totalorder %s459_s28, %s460_s29  ;;  %p466_p8 = scmp.lt.s32.totalorder %s464_s9, %s460_s29 }
  0x48   : > { %p462_p5 = pnand %p461_p4, %p595_p9  ;;  %p467_p10 = por %p466_p8, %p465_p7 }
  0x4a   : > { %p463_p6 = pneg %p462_p5 }
  0x4c   : > { %p468_p13 = pnand %p467_p10, %p463_p6 }
  0x4e   : > { %471 = shalt.err (!%p468_p13)
}
  0x4f   : > { %s532_s5 = smov 32   ;;  %s533_s12 = smov 2  }
  0x50   : > { %348 = dma.vmem_to_hbm [thread:$0]  (%p595_p9), %s231_s22, 160, %s233_s26, %s217_s27, %s532_s5, %s532_s5, %s533_s12  }
  0x51 PF: > { %s247_s13 = sand.u32 1, %s508_s6   ;;  %p355_p0 = pnand %p331_p12, %p602_p11 }
  0x52   : > { %s248_s15 = scalar_lea.sflag [#allocation5], %s247_s13 }
  0x53   : > { %p356_p1 = pneg %p355_p0 }
  0x55   : > { %503 = dma.done.wait (%p356_p1), %s248_s15, 160  }
  0x56   : > { %505 = vsyncadd (%p356_p1), %s248_s15, 4294967136  ;;  %s17_s11 = sadd.s32 1, %s528_s11   ;;  %s676_s6 = smov %s512_s7 }
  0x57   : > { %p14_p2 = scmp.ge.s32.totalorder %s17_s11, 4   ;;  %s677_s7 = smov %s516_s8 }
  0x58   : > { %s678_s8 = smov %s600_s20  ;;  %s679_s9 = smov %s524_s10 }
  0x59   : > { %s680_s10 = smov %s682_s14  ;;  %16 = sbr.rel (!%p14_p2) target bundleno = 6 (0x6), region = 109 }
  0x5e   :  { %254 = vsyncpa [#allocation4], 1 }
  0x5f   :  { %256 = vsyncpa [#allocation4 + $0x1], 1 }
  0x60   :  { %257 = vsyncpa [#allocation5], 1 }
  0x61   :  { %259 = vsyncpa [#allocation5 + $0x1], 1 }
  0x62   :  { %260 = vsyncmov [#allocation2] }
  0x65   :  { %s261_s19 = vpop.sfrf %260 }
  0x66   :  { %p342_p9 = scmp.ne.s32.totalorder %s261_s19, 0 }
  0x68   :  { %265 = shalt.err (%p342_p9)  }

</bundles_post_ra>
